<compile_context>
chip_gen: v7x
topology: tpu7x:2x2x1
jax: 0.10.0
libtpu: 0.0.40
codegen_flags: <defaults>
</compile_context>

<pallas_src>
import functools

import jax
import jax.numpy as jnp
from jax import lax
from jax.experimental import pallas as pl
from jax.experimental.pallas import tpu as pltpu

KERNEL_SIZE = 1000  # matches nn.MaxPool1d(kernel_size=1000)


def _round_up(x, m):
    return ((x + m - 1) // m) * m


def _device_kind():
    try:
        return jax.devices()[0].device_kind.lower()
    except Exception:
        return ""


def _maxpool_kernel(x_ref, o_ref, *, win, chunk, nacc, unroll):
    """Max over rows [0, win) of x_ref (TB, Lb, TC) -> o_ref (TB, TC)."""
    num_chunks = win // chunk
    if num_chunks == 0:
        # Tiny window: direct reduce (only a handful of rows live).
        o_ref[...] = jnp.max(x_ref[:, 0:win, :], axis=1).astype(o_ref.dtype)
        return

    nacc = min(nacc, num_chunks)

    def load(start):
        return x_ref[:, pl.ds(start, chunk), :]

    # Independent accumulators break the serial jnp.maximum dependency chain.
    accs = tuple(load(pl.multiple_of(a * chunk, chunk)) for a in range(nacc))

    n_groups = num_chunks // nacc
    rem = num_chunks - n_groups * nacc

    def body(g, accs):
        out = []
        for a in range(nacc):
            start = pl.multiple_of((g * nacc + a) * chunk, chunk)
            out.append(jnp.maximum(accs[a], load(start)))
        return tuple(out)

    if n_groups > 1:
        accs = lax.fori_loop(1, n_groups, body, accs, unroll=unroll)

    accs = list(accs)
    # Remaining full chunks (at most nacc - 1 of them).
    for a in range(rem):
        start = pl.multiple_of((n_groups * nacc + a) * chunk, chunk)
        accs[a % nacc] = jnp.maximum(accs[a % nacc], load(start))

    # Tail rows [num_chunks*chunk, win): cover them with an overlapping chunk
    # starting at win - chunk.  Max is idempotent, so re-reducing rows is fine,
    # and we never touch rows >= win (so no masking and no host slice).
    if num_chunks * chunk < win:
        accs[0] = jnp.maximum(accs[0], load(win - chunk))

    # Combine accumulators (VPU), then one cross-sublane reduce (XLU).
    while len(accs) > 1:
        nxt = [jnp.maximum(accs[i], accs[i + 1]) for i in range(0, len(accs) - 1, 2)]
        if len(accs) % 2:
            nxt.append(accs[-1])
        accs = nxt
    o_ref[...] = jnp.max(accs[0], axis=1).astype(o_ref.dtype)


def _pick_channel_tile(c, rows, itemsize, sublane, budget):
    def fits(t):
        return _round_up(rows, sublane) * _round_up(t, 128) * itemsize <= budget

    if fits(c):
        return c  # full channel axis: one fully contiguous DMA per batch row
    for t in (1024, 512, 256, 128):
        if c % t == 0 and fits(t):
            return t
    for t in range(c - 1, 0, -1):
        if c % t == 0 and fits(t):
            return t
    return 1


def _pick_batch_tile(b, cap, sublane):
    cap = max(1, min(b, cap))
    best = None
    for d in range(cap, 0, -1):
        if b % d:
            continue
        if best is None:
            best = d
        if d == b or d % sublane == 0:  # dense (unmasked) output sublane stores
            return d
    return best or 1


def max_pooling(x: jax.Array, *, kernel_size: int = KERNEL_SIZE) -> jax.Array:
    """Pallas equivalent of MaxPooling.forward for x of shape (B, L, C).

    Matches nn.MaxPool1d(kernel_size)(x.permute(0, 2, 1)).squeeze(-1), which
    requires exactly one pooling window: kernel_size <= L < 2 * kernel_size.
    Returns (B, C) with the same dtype as x.
    """
    B, L, C = x.shape
    K = kernel_size
    assert K <= L < 2 * K, (
        "MaxPooling kernel implements the single-window case "
        f"({K} <= L < {2 * K}); got L={L}"
    )

    itemsize = jnp.dtype(x.dtype).itemsize
    sublane = 8 * max(1, 4 // itemsize)  # 8 (f32) / 16 (bf16) / 32 (int8)
    chunk = sublane

    # --- Narrow-channel lane folding (free row-major reshape when L == K) -----
    fold = 1
    if L == K and C < 128:
        r_cap = max(1, 512 // C)
        for r in range(min(K, r_cap), 1, -1):
            if K % r == 0:
                fold = r
                break

    if fold > 1:
        x_in = x.reshape(B, K // fold, fold * C)  # contiguous -> bitcast reshape
        Ck = fold * C
        L_in = K // fold
        win = K // fold
    else:
        x_in = x
        Ck = C
        L_in = L
        win = K

    # Sequence-axis block: select the window via BlockSpec when the tile rule
    # allows it, otherwise take the full L (always legal) and let the kernel
    # read only rows [0, win).
    blk_l = win if (win == L_in or win % sublane == 0) else L_in

    # --- Per-chip planning -----------------------------------------------------
    kind = _device_kind()
    is_v7 = "v7" in kind
    per_buf_budget = (8 if is_v7 else 12) * 1024 * 1024
    vmem_limit = (48 if is_v7 else 64) * 1024 * 1024

    tc = _pick_channel_tile(Ck, blk_l, itemsize, sublane, per_buf_budget)
    bytes_per_batch = _round_up(blk_l, sublane) * _round_up(tc, 128) * itemsize
    tb_cap = max(1, per_buf_budget // bytes_per_batch)
    if is_v7 and B >= 2 and (Ck // tc) < 2:
        # Only v7x has 2 TensorCores; keep >= 2 grid steps for megacore sharding.
        tb_cap = min(tb_cap, max(1, B // 2))
    tb = _pick_batch_tile(B, tb_cap, sublane)

    grid = (B // tb, Ck // tc)

    kernel = functools.partial(_maxpool_kernel, win=win, chunk=chunk, nacc=4, unroll=2)

    cost = pl.CostEstimate(
        flops=B * K * C,  # one compare per input element
        transcendentals=0,
        bytes_accessed=B * K * C * itemsize + B * C * itemsize,
    )

    out = pl.pallas_call(
        kernel,
        out_shape=jax.ShapeDtypeStruct((B, Ck), x.dtype),
        grid_spec=pltpu.PrefetchScalarGridSpec(
            num_scalar_prefetch=0,
            grid=grid,
            in_specs=[pl.BlockSpec((tb, blk_l, tc), lambda bi, ci: (bi, 0, ci))],
            out_specs=pl.BlockSpec((tb, tc), lambda bi, ci: (bi, ci)),
        ),
        compiler_params=pltpu.CompilerParams(
            dimension_semantics=("parallel", "parallel"),
            vmem_limit_bytes=vmem_limit,
        ),
        cost_estimate=cost,
    )(x_in)

    if fold > 1:
        # Finish the fold: tiny (B, fold, C) max in plain JAX.
        out = jnp.max(out.reshape(B, fold, C), axis=1)
    return out


def max_pooling_ref(x: jax.Array, *, kernel_size: int = KERNEL_SIZE) -> jax.Array:
    # Pure-JAX reference mirroring the PyTorch forward (single window).
    return jnp.max(x[:, :kernel_size, :], axis=1)


if __name__ == "__main__":
    key = jax.random.PRNGKey(0)
    k1, k2, k3, k4 = jax.random.split(key, 4)

    # Case 1: toy shape implied by the module (B=2, L=1000 == kernel_size, C=8)
    # — exercises the narrow-channel lane-folding path.
    x1 = jax.random.normal(k1, (2, KERNEL_SIZE, 8), dtype=jnp.float32)
    o1 = jax.block_until_ready(max_pooling(x1))
    assert o1.shape == (2, 8) and o1.dtype == x1.dtype, (o1.shape, o1.dtype)
    assert jnp.array_equal(o1, max_pooling_ref(x1)), "Pallas kernel mismatch (case 1)"

    # Case 2: wide channels, multi-batch block, full-C contiguous DMA rows.
    x2 = jax.random.normal(k2, (4, KERNEL_SIZE, 256), dtype=jnp.float32)
    o2 = jax.block_until_ready(max_pooling(x2))
    assert o2.shape == (4, 256), o2.shape
    assert jnp.array_equal(o2, max_pooling_ref(x2)), "Pallas kernel mismatch (case 2)"

    # Case 3: L > kernel_size (f32) — window selected purely via the BlockSpec.
    x3 = jax.random.normal(k3, (2, 1200, 8), dtype=jnp.float32)
    o3 = jax.block_until_ready(max_pooling(x3))
    assert o3.shape == (2, 8), o3.shape
    assert jnp.array_equal(o3, max_pooling_ref(x3)), "Pallas kernel mismatch (case 3)"

    # Case 4: bf16 with L > kernel_size — full-L block, 16-row chunks,
    # overlapping tail chunk, no host slice and no full-block fallback.
    x4 = jax.random.normal(k4, (2, 1200, 128), dtype=jnp.float32).astype(jnp.bfloat16)
    o4 = jax.block_until_ready(max_pooling(x4))
    assert o4.shape == (2, 128) and o4.dtype == jnp.bfloat16, (o4.shape, o4.dtype)
    assert jnp.array_equal(o4, max_pooling_ref(x4)), "Pallas kernel mismatch (case 4)"

    print("KERNEL_OK")
</pallas_src>

<mosaic_0001>
module attributes {stable_mosaic.version = 11 : i64} {
  func.func @_maxpool_kernel(%arg0: i32, %arg1: i32, %arg2: memref<2x20x400xf32, #tpu.memory_space<vmem>>, %arg3: memref<2x400xf32, #tpu.memory_space<vmem>>) attributes {dimension_semantics = [#tpu.dimension_semantics<parallel>, #tpu.dimension_semantics<parallel>], iteration_bounds = array<i64: 1, 1>, scalar_prefetch = 0 : i64, scratch_operands = 0 : i64, tpu.core_type = #tpu.core_type<tc>, window_params = [{transform_indices = @transform_0, window_bounds = array<i64: 2, 20, 400>}, {transform_indices = @transform_1, window_bounds = array<i64: 2, 400>}]} {
    %c0_i32 = arith.constant 0 : i32
    %0 = tpu.assume_multiple %c0_i32, 8 : i32
    %c0 = arith.constant 0 : index
    %1 = arith.index_cast %0 : i32 to index
    %c0_0 = arith.constant 0 : index
    %2 = vector.load %arg2[%c0, %1, %c0_0] : memref<2x20x400xf32, #tpu.memory_space<vmem>>, vector<2x8x400xf32>
    %c8_i32 = arith.constant 8 : i32
    %3 = tpu.assume_multiple %c8_i32, 8 : i32
    %c0_1 = arith.constant 0 : index
    %4 = arith.index_cast %3 : i32 to index
    %c0_2 = arith.constant 0 : index
    %5 = vector.load %arg2[%c0_1, %4, %c0_2] : memref<2x20x400xf32, #tpu.memory_space<vmem>>, vector<2x8x400xf32>
    %c0_3 = arith.constant 0 : index
    %c12 = arith.constant 12 : index
    %c0_4 = arith.constant 0 : index
    %6 = vector.load %arg2[%c0_3, %c12, %c0_4] : memref<2x20x400xf32, #tpu.memory_space<vmem>>, vector<2x8x400xf32>
    %7 = arith.maximumf %2, %6 : vector<2x8x400xf32>
    %8 = arith.maximumf %7, %5 : vector<2x8x400xf32>
    %cst = arith.constant dense<0xFF800000> : vector<2x400xf32>
    %9 = vector.multi_reduction <maximumf>, %8, %cst [1] : vector<2x8x400xf32> to vector<2x400xf32>
    %c0_5 = arith.constant 0 : index
    %c0_6 = arith.constant 0 : index
    %10 = vector.load %arg3[%c0_5, %c0_6] : memref<2x400xf32, #tpu.memory_space<vmem>>, vector<2x400xf32>
    tpu.vector_store %arg3[%c0_5, %c0_6], %9 {strides = array<i32>} : memref<2x400xf32, #tpu.memory_space<vmem>>, vector<2x400xf32>,
    return
  }
  func.func @transform_0(%arg0: i32, %arg1: i32) -> (i32, i32, i32) {
    %c0_i32 = arith.constant 0 : i32
    %c0_i32_0 = arith.constant 0 : i32
    return %arg0, %c0_i32, %arg1 : i32, i32, i32
  }
  func.func @transform_1(%arg0: i32, %arg1: i32) -> (i32, i32) {
    %c0_i32 = arith.constant 0 : i32
    return %arg0, %arg1 : i32, i32
  }
}

</mosaic_0001>

<bundles_post_ra>
// kernel: tpu_custom_call.1
= control target key start
LH: loop header
LB: loop body
LE: loop exit
PB: predicated region body
PF: predicated region fallthrough
CT: control target
= control target key end

     0   :  { %6 = vsyncpa [#allocation3], 0  ;;  %s367_s0 = inlined_call_operand.hbm [shape: f32[2,20,400], index: 0, kind: input, shape index: {}]   ;;  %s368_s1 = inlined_call_operand.hbm [shape: f32[2,400], index: 1, kind: output, shape index: {}]  }
   0x1   :  { %7 = vsyncpa [#allocation4], 0  ;;  %s310_s6 = smov [#allocation2]   ;;  %s262_s10 = scalar_lea.hbm %s367_s0, 3072 }
   0x2   :  { %s13_s7 = sshll.u32 %s310_s6, 4  ;;  %p263_p0 = scmp.ne.s32.totalorder %s367_s0, %s262_s10  ;;  %s14_s7 = int_to_ptr.vmem [resolvable:$true] %s13_s7 }
   0x3   :  { %p266_p1 = scmp.lt.u32.totalorder %s262_s10, %s367_s0 }
   0x5   :  { %p268_p2 = pnand %p266_p1, %p263_p0 }
   0x7   :  { %271 = shalt.err (!%p268_p2)
}
   0x8   :  { %s272_s15 = scalar_lea.vmem %s14_s7, 3072  ;;  %p277_p4 = scmp.lt.s32.totalorder %s14_s7, %s14_s7 }
   0x9   :  { %p273_p3 = scmp.ne.s32.totalorder %s14_s7, %s272_s15  ;;  %p278_p5 = scmp.lt.s32.totalorder %s272_s15, %s272_s15 }
   0xb   :  { %p279_p6 = por %p278_p5, %p277_p4 }
   0xd   :  { %p280_p7 = pnand %p279_p6, %p273_p3 }
   0xf   :  { %283 = shalt.err (!%p280_p7)
}
  0x10   :  { %s311_s16 = smov 512   ;;  %s312_s17 = smov 32  }
  0x11   :  { %19 = dma.hbm_to_vmem [thread:$0]  %s367_s0, 3072, %s14_s7, [#allocation3], %s311_s16, %s311_s16, %s312_s17  }
  0x12   :  { %306 = dma.done.wait [#allocation3], 3072  }
  0x13   :  { %307 = vsyncadd [#allocation3], 4294964224  ;;  %v190_v0 = vlaneseq  ;;  %v45_v1 = vld [vmem:[#allocation2 + $0x20] sm:$0xf0]  ;;  %v46_v2 = vld [vmem:[#allocation2 + $0x28] sm:$0xf0] }
  0x14   :  { %vm77_vm0 = vcmask 1043456   ;;  %v313_v3 = vmov 1983009808   ;;  %v47_v6 = vld [vmem:[#allocation2 + $0x30] sm:$0xf0]  ;;  %v26_v15 = vld [vmem:[#allocation2] sm:$0xff] }
  0x15   :  { %v337_v4 = vunpack.c.l.s4 %v313_v3  ;;  %v339_v5 = vshrl.u32 %v190_v0, 7  ;;  %v48_v7 = vld [vmem:[#allocation2 + $0x38] sm:$0xf0]  ;;  %v49_v8 = vld [vmem:[#allocation2 + $0x40] sm:$0xf]  ;;  %v78_v19 = vrot.slane %v45_v1, 4 }
  0x16   :  { %v50_v9 = vld [vmem:[#allocation2 + $0x48] sm:$0xf]  ;;  %v51_v10 = vld [vmem:[#allocation2 + $0x50] sm:$0xf]  ;;  %v52_v11 = vld [vmem:[#allocation2 + $0x58] sm:$0xf] }
  0x17   :  { %v53_v12 = vld [vmem:[#allocation2 + $0x80] sm:$0xf0]  ;;  %v54_v13 = vld [vmem:[#allocation2 + $0x88] sm:$0xf0]  ;;  %v55_v14 = vld [vmem:[#allocation2 + $0x90] sm:$0xf0]  ;;  %v189_v21 = vunpack.c.0.s8 %v337_v4 }
  0x18   :  { %v56_v16 = vld [vmem:[#allocation2 + $0x98] sm:$0xf0]  ;;  %v57_v17 = vld [vmem:[#allocation2 + $0xa0] sm:$0xf]  ;;  %v58_v18 = vld [vmem:[#allocation2 + $0xa8] sm:$0xf] }
  0x19   :  { %v79_v20 = vrot.slane %v49_v8, 4  ;;  %v59_v22 = vld [vmem:[#allocation2 + $0xb0] sm:$0xf]  ;;  %v81_v23 = vrot.slane %v46_v2, 4  ;;  %v82_v24 = vrot.slane %v50_v9, 4  ;;  %v84_v25 = vrot.slane %v47_v6, 4 }
  0x1a   :  { %v85_v26 = vrot.slane %v51_v10, 4  ;;  %v27_v27 = vld [vmem:[#allocation2 + $0x8] sm:$0xff]  ;;  %v60_v28 = vld [vmem:[#allocation2 + $0xb8] sm:$0xf]  ;;  %v87_v30 = vrot.slane %v48_v7, 4  ;;  %v88_v31 = vrot.slane %v52_v11, 4 }
  0x1b   :  { %v80_v29 = vsel %vm77_vm0, %v78_v19, %v79_v20  ;;  %v90_v32 = vrot.slane %v53_v12, 4  ;;  %vm144_vm1 = vcmask 130048   ;;  %v28_v33 = vld [vmem:[#allocation2 + $0x10] sm:$0xff]  ;;  %v29_v34 = vld [vmem:[#allocation2 + $0x18] sm:$0xff]  ;;  %v30_v35 = vld [vmem:[#allocation2 + $0x60] sm:$0xff]  ;;  %v83_v36 = vsel %vm77_vm0, %v81_v23, %v82_v24  ;;  %s314_s0 = smov [#allocation5]  }
  0x1c   :  { %v86_v37 = vsel %vm77_vm0, %v84_v25, %v85_v26  ;;  %v91_v38 = vrot.slane %v57_v17, 4  ;;  %v93_v39 = vrot.slane %v54_v13, 4  ;;  %v31_v40 = vld [vmem:[#allocation2 + $0x68] sm:$0xff]  ;;  %v32_v41 = vld [vmem:[#allocation2 + $0x70] sm:$0xff]  ;;  %v33_v42 = vld [vmem:[#allocation2 + $0x78] sm:$0xff]  ;;  %v89_v43 = vsel %vm77_vm0, %v87_v30, %v88_v31  ;;  %s247_s20 = sshll.u32 %s314_s0, 4  ;;  %s248_s20 = int_to_ptr.vmem [resolvable:$true] %s247_s20 }
  0x1d   :  { %v94_v44 = vrot.slane %v58_v18, 4  ;;  %v96_v45 = vrot.slane %v55_v14, 4  ;;  %v97_v46 = vrot.slane %v59_v22, 4  ;;  %v37_v47 = vld [vmem:[#allocation2 + $0x20] sm:$0xff]  ;;  %v38_v48 = vld [vmem:[#allocation2 + $0x28] sm:$0xff]  ;;  %v39_v49 = vld [vmem:[#allocation2 + $0x30] sm:$0xff]  ;;  %v110_v53 = vmax.f32 %v26_v15, %v80_v29  ;;  %p289_p9 = scmp.lt.s32.totalorder %s248_s20, %s248_s20 }
  0x1e   :  { %v92_v50 = vsel %vm77_vm0, %v90_v32, %v91_v38  ;;  %v99_v51 = vrot.slane %v56_v16, 4  ;;  %v100_v52 = vrot.slane %v60_v28, 4  ;;  %v40_v54 = vld [vmem:[#allocation2 + $0x38] sm:$0xff]  ;;  %v41_v55 = vld [vmem:[#allocation2 + $0x80] sm:$0xff]  ;;  %v42_v56 = vld [vmem:[#allocation2 + $0x88] sm:$0xff]  ;;  %v111_v59 = vmax.f32 %v27_v27, %v83_v36  ;;  %s284_s21 = scalar_lea.vmem %s248_s20, 128 }
  0x1f   :  { %v95_v57 = vsel %vm77_vm0, %v93_v39, %v94_v44  ;;  %v98_v58 = vsel %vm77_vm0, %v96_v45, %v97_v46  ;;  %v112_v60 = vmax.f32 %v28_v33, %v86_v37  ;;  %v43_v61 = vld [vmem:[#allocation2 + $0x90] sm:$0xff]  ;;  %v44_v62 = vld [vmem:[#allocation2 + $0x98] sm:$0xff]  ;;  %v113_v0 = vmax.f32 %v29_v34, %v89_v43  ;;  %p285_p8 = scmp.ne.s32.totalorder %s248_s20, %s284_s21  ;;  %p290_p10 = scmp.lt.s32.totalorder %s284_s21, %s284_s21 }
  0x20   :  { %v101_v63 = vsel %vm77_vm0, %v99_v51, %v100_v52  ;;  %v114_v1 = vmax.f32 %v30_v35, %v92_v50  ;;  %v115_v2 = vmax.f32 %v31_v40, %v95_v57  ;;  %v116_v3 = vmax.f32 %v32_v41, %v98_v58 }
  0x21   :  { %v117_v6 = vmax.f32 %v33_v42, %v101_v63  ;;  %v118_v7 = vmax.f32 %v110_v53, %v37_v47  ;;  %v119_v8 = vmax.f32 %v111_v59, %v38_v48  ;;  %v120_v9 = vmax.f32 %v112_v60, %v39_v49  ;;  %p291_p11 = por %p290_p10, %p289_p9 }
  0x22   :  { %v121_v10 = vmax.f32 %v113_v0, %v40_v54  ;;  %v122_v11 = vmax.f32 %v114_v1, %v41_v55  ;;  %v123_v12 = vmax.f32 %v115_v2, %v42_v56  ;;  %v124_v13 = vmax.f32 %v116_v3, %v43_v61 }
  0x23   :  { %v125_v14 = vmax.f32 %v117_v6, %v44_v62  ;;  %v126_v15 = vrot.slane %v118_v7, 4  ;;  %v132_v16 = vrot.slane %v119_v8, 4  ;;  %v138_v17 = vrot.slane %v120_v9, 4  ;;  %p292_p12 = pnand %p291_p11, %p285_p8 }
  0x24   :  { %v145_v18 = vsel %vm144_vm1, %v121_v10, -inf  ;;  %v152_v19 = vrot.slane %v122_v11, 4  ;;  %v158_v20 = vrot.slane %v123_v12, 4  ;;  %v164_v25 = vrot.slane %v124_v13, 4 }
  0x25   :  { %v127_v22 = vmax.f32 %v118_v7, %v126_v15  ;;  %v133_v23 = vmax.f32 %v119_v8, %v132_v16  ;;  %v146_v24 = vrot.slane %v145_v18, 4  ;;  %v139_v26 = vmax.f32 %v120_v9, %v138_v17 }
  0x26   :  { %v153_v27 = vmax.f32 %v122_v11, %v152_v19  ;;  %v159_v28 = vmax.f32 %v123_v12, %v158_v20  ;;  %v170_v29 = vsel %vm144_vm1, %v125_v14, -inf  ;;  %v165_v33 = vmax.f32 %v124_v13, %v164_v25 }
  0x27   :  { %v128_v30 = vrot.slane %v127_v22, 2  ;;  %v134_v31 = vrot.slane %v133_v23, 2  ;;  %v147_v32 = vmax.f32 %v145_v18, %v146_v24  ;;  %v140_v34 = vrot.slane %v139_v26, 2 }
  0x28   :  { %v154_v35 = vrot.slane %v153_v27, 2  ;;  %v160_v36 = vrot.slane %v159_v28, 2  ;;  %v171_v37 = vrot.slane %v170_v29, 4  ;;  %v166_v41 = vrot.slane %v165_v33, 2 }
  0x29   :  { %v129_v38 = vmax.f32 %v127_v22, %v128_v30  ;;  %v135_v39 = vmax.f32 %v133_v23, %v134_v31  ;;  %v148_v40 = vrot.slane %v147_v32, 2  ;;  %v141_v42 = vmax.f32 %v139_v26, %v140_v34 }
  0x2a   :  { %v155_v43 = vmax.f32 %v153_v27, %v154_v35  ;;  %v161_v44 = vmax.f32 %v159_v28, %v160_v36  ;;  %v172_v45 = vmax.f32 %v170_v29, %v171_v37  ;;  %v167_v49 = vmax.f32 %v165_v33, %v166_v41 }
  0x2b   :  { %v130_v46 = vrot.slane %v129_v38, 1  ;;  %v136_v47 = vrot.slane %v135_v39, 1  ;;  %v149_v48 = vmax.f32 %v147_v32, %v148_v40  ;;  %v142_v50 = vrot.slane %v141_v42, 1 }
  0x2c   :  { %v156_v51 = vrot.slane %v155_v43, 1  ;;  %v162_v52 = vrot.slane %v161_v44, 1  ;;  %v173_v53 = vrot.slane %v172_v45, 2  ;;  %v168_v57 = vrot.slane %v167_v49, 1 }
  0x2d   :  { %v131_v54 = vmax.f32 %v129_v38, %v130_v46  ;;  %v137_v55 = vmax.f32 %v135_v39, %v136_v47  ;;  %v150_v56 = vrot.slane %v149_v48, 1  ;;  %v143_v58 = vmax.f32 %v141_v42, %v142_v50 }
  0x2e   :  { %v157_v59 = vmax.f32 %v155_v43, %v156_v51  ;;  %v163_v60 = vmax.f32 %v161_v44, %v162_v52  ;;  %v174_v61 = vmax.f32 %v172_v45, %v173_v53  ;;  %v192_v63 = vsub.s32 %v189_v21, %v339_v5 }
  0x2f   :  { %v151_v62 = vmax.f32 %v149_v48, %v150_v56  ;;  %v169_v0 = vmax.f32 %v167_v49, %v168_v57  ;;  %v185_v2 = vcombine.low %v131_v54, %v137_v55  ;;  %vm233_vm2 = vcmask 1041408  }
  0x30   :  { %v175_v1 = vrot.slane %v174_v61, 1  ;;  %v202_v3 = vcombine.low %v157_v59, %v163_v60  ;;  %vm234_vm3 = vcmask 1043458   ;;  %vm236_vm5 = vcmask 1045508  }
  0x31   :  { %v186_v6 = vcombine.low %v143_v58, %v151_v62  ;;  %v193_v8 = vrot.slane %v185_v2, %v192_v63  ;;  %vm235_vm4 = vmor %vm234_vm3, %vm233_vm2  ;;  %vm224_vm6 = vcmask 1041409   ;;  %vm226_vm7 = vcmask 1043459  }
  0x32   :  { %v176_v7 = vmax.f32 %v174_v61, %v175_v1  ;;  %v210_v11 = vrot.slane %v202_v3, %v192_v63  ;;  %vm237_vm8 = vmor %vm236_vm5, %vm235_vm4  ;;  %vm238_vm9 = vcmask 130054   ;;  %vm228_vm10 = vcmask 1045509  }
  0x33   :  { %v200_v9 = vrot.slane %v186_v6, %v192_v63  ;;  %vm230_vm11 = vcmask 1047559   ;;  %vm239_vm12 = vmor %vm238_vm9, %vm237_vm8 }
  0x34   :  { %v203_v10 = vcombine.low %v169_v0, %v176_v7 }
  0x35   :  { %v201_v13 = vcombine.low %v193_v8, %v200_v9 }
  0x36   :  { %v217_v12 = vrot.slane %v203_v10, %v192_v63 }
  0x38   :  { %v218_v14 = vcombine.low %v210_v11, %v217_v12 }
  0x3a   :  { %v223_v4 = vrot.slane %v218_v14, 7 }
  0x3c   :  { %v225_v5 = vsel %vm224_vm6, %v223_v4, %v201_v13 }
  0x3d   :  { %v227_v21 = vsel %vm226_vm7, %v223_v4, %v225_v5 }
  0x3e   :  { %v229_v15 = vsel %vm228_vm10, %v223_v4, %v227_v21 }
  0x3f   :  { %v231_v16 = vsel %vm230_vm11, %v223_v4, %v229_v15 }
  0x40   :  { %240 = vst.msk [vmem:[#allocation5] sm:$0xff] %vm239_vm12, %v231_v16 }
  0x41   :  { %295 = shalt.err (!%p292_p12)
}
  0x42   :  { %s296_s24 = scalar_lea.hbm %s368_s1, 128 }
  0x43   :  { %p297_p13 = scmp.ne.s32.totalorder %s368_s1, %s296_s24  ;;  %p300_p0 = scmp.lt.u32.totalorder %s296_s24, %s368_s1 }
  0x45   :  { %p302_p1 = pnand %p300_p0, %p297_p13 }
  0x47   :  { %305 = shalt.err (!%p302_p1)
}
  0x48   :  { %250 = dma.vmem_to_hbm [thread:$0]  %s248_s20, 128, %s368_s1, [#allocation4]  }
  0x49   :  { %308 = dma.done.wait [#allocation4], 128  }
  0x4a   :  { %309 = vsyncadd [#allocation4], 4294967168 }
  0x4b   :  { %254 = vsyncpa [#allocation3], 1 }
  0x4c   :  { %255 = vsyncpa [#allocation4], 1 }

</bundles_post_ra>
